<compile_context>
chip_gen: v7x
topology: tpu7x:2x2x1
jax: 0.10.0
libtpu: 0.0.40
codegen_flags: <defaults>
</compile_context>

<pallas_src>
import functools

import jax
import jax.numpy as jnp
from jax import lax
from jax.experimental import pallas as pl
from jax.experimental.pallas import tpu as pltpu


def _round_up(x, m):
    return (x + m - 1) // m * m


def head_kernel(h_ref, y_ref, w_ref, b_ref, prob_ref, pred_ref, loss_ref, *,
                tb, b_true, l_true, l_pad):
    # h_ref:    [tb, H]    bf16 CLS hidden tile
    # y_ref:    [tb, Lp]   bf16 padded multi-hot labels (exact 0/1)
    # w_ref:    [H, Lp]    bf16 fused weight (W1 @ W2 when more_linear_mapping)
    # b_ref:    [1, Lp]    f32  fused bias
    # prob_ref: [tb, Lp]   bf16 sigmoid(logits)
    # pred_ref: [tb, Lp]   int8 (prob > 0.5)
    # loss_ref: [8, 128]   f32  per-tile partial of the mean BCE (broadcast)

    # Fused head: logits = h @ (W1 @ W2) + (b1 @ W2 + b2)
    logits = jnp.dot(h_ref[...], w_ref[...],
                     preferred_element_type=jnp.float32) + b_ref[...]

    # One exp serves both sigmoid and the softplus term of the BCE (EUP).
    e = jnp.exp(-jnp.abs(logits))
    inv = 1.0 / (1.0 + e)
    prob = jnp.where(logits >= 0.0, inv, e * inv)
    prob_ref[...] = prob.astype(prob_ref.dtype)

    # predictions: prob > 0.5  <=>  logits > 0  (sigmoid is monotone)
    pred_ref[...] = (logits > 0.0).astype(jnp.int8)

    # Stable BCE from logits: max(z,0) - z*y + log(1 + exp(-|z|)).
    y = y_ref[...].astype(jnp.float32)
    bce = jnp.maximum(logits, 0.0) - logits * y + jnp.log(1.0 + e)

    # Mask padded rows/columns out of the mean — only if padding exists
    # (trace-time decision, no filler ops in the exactly-tiled case).
    if b_true % tb != 0:
        row = pl.program_id(0) * tb + lax.broadcasted_iota(jnp.int32, bce.shape, 0)
        bce = jnp.where(row < b_true, bce, 0.0)
    if l_true != l_pad:
        col = lax.broadcasted_iota(jnp.int32, bce.shape, 1)
        bce = jnp.where(col < l_true, bce, 0.0)

    # Per-tile partial (no cross-step resident accumulator) so the batch grid
    # axis can be "parallel" (shards across v7x's 2 TensorCores). Normalized
    # by the TRUE B*L so padding does not skew the mean.
    partial = jnp.sum(bce) * (1.0 / float(b_true * l_true))
    loss_ref[...] = jnp.full(loss_ref.shape, partial, dtype=jnp.float32)


def multi_label_classifier_forward(hidden, labels, w1, b1, w2, b2,
                                    *, more_linear_mapping=True):
    """Classifier head in a single Pallas call.

    hidden: [B, S, H] f32 encoder output (synthetic stand-in for BERT)
    labels: [B, L]    multi-hot targets
    w1,b1:  one_more_layer params  ([H,H] pre-transposed [in,out], [H])
    w2,b2:  classifier params      ([H,L] pre-transposed [in,out], [L])
    Returns (prob [B,L] f32, loss scalar f32, pred [B,L] int32).
    """
    # CLS-token selection (kept in wrapper — free slice on [B, S, H]).
    hidden_head = hidden[:, 0, :]
    B, H = hidden_head.shape
    L = w2.shape[1]

    # Algebraic fusion of the two back-to-back Linears (no activation between
    # them in the original module): one matmul in the kernel instead of two.
    if more_linear_mapping:
        w_eff = jnp.dot(w1, w2, preferred_element_type=jnp.float32)
        b_eff = jnp.dot(b1, w2, preferred_element_type=jnp.float32) + b2
    else:
        w_eff, b_eff = w2, b2

    # Tiling: batch tile multiple of 32 (int8 pred sublane packing), capped at
    # 512 to amortize per-step overhead / fill the MXU; lane-dense label axis.
    tb = min(512, _round_up(B, 32))
    B_pad = _round_up(B, tb)
    L_pad = _round_up(L, 128)
    nb = B_pad // tb

    # Single bf16 cast, then pad (no redundant f32 pass over activations).
    h_p = jnp.pad(hidden_head.astype(jnp.bfloat16), ((0, B_pad - B), (0, 0)))
    y_p = jnp.pad(labels.astype(jnp.bfloat16), ((0, B_pad - B), (0, L_pad - L)))
    w_p = jnp.pad(w_eff, ((0, 0), (0, L_pad - L))).astype(jnp.bfloat16)
    b_p = jnp.pad(b_eff, (0, L_pad - L)).reshape(1, L_pad).astype(jnp.float32)

    kernel = functools.partial(head_kernel, tb=tb, b_true=B, l_true=L,
                               l_pad=L_pad)

    out_shapes = (
        jax.ShapeDtypeStruct((B_pad, L_pad), jnp.bfloat16),   # prob
        jax.ShapeDtypeStruct((B_pad, L_pad), jnp.int8),       # pred
        jax.ShapeDtypeStruct((8 * nb, 128), jnp.float32),     # per-tile loss
    )

    prob_p, pred_p, loss_parts = pl.pallas_call(
        kernel,
        out_shape=out_shapes,
        grid=(nb,),
        in_specs=[
            pl.BlockSpec((tb, H), lambda i: (i, 0)),       # hidden tile
            pl.BlockSpec((tb, L_pad), lambda i: (i, 0)),   # labels tile
            pl.BlockSpec((H, L_pad), lambda i: (0, 0)),    # fused W (resident)
            pl.BlockSpec((1, L_pad), lambda i: (0, 0)),    # fused b (resident)
        ],
        out_specs=(
            pl.BlockSpec((tb, L_pad), lambda i: (i, 0)),
            pl.BlockSpec((tb, L_pad), lambda i: (i, 0)),
            pl.BlockSpec((8, 128), lambda i: (i, 0)),      # per-tile partial
        ),
        compiler_params=pltpu.CompilerParams(
            # No resident accumulator -> the batch axis is truly independent.
            dimension_semantics=("parallel",),
            vmem_limit_bytes=32 * 1024 * 1024),
    )(h_p, y_p, w_p, b_p)

    prob = prob_p[:B, :L].astype(jnp.float32)
    pred = pred_p[:B, :L].astype(jnp.int32)
    loss = jnp.sum(loss_parts[::8, 0])     # one partial per batch tile
    return prob, loss, pred


def reference_forward(hidden, labels, w1, b1, w2, b2, *, more_linear_mapping=True):
    """Plain-JAX reference mirroring the kernel's fused bf16/f32 math."""
    h = hidden[:, 0, :].astype(jnp.bfloat16)
    if more_linear_mapping:
        w_eff = jnp.dot(w1, w2, preferred_element_type=jnp.float32)
        b_eff = jnp.dot(b1, w2, preferred_element_type=jnp.float32) + b2
    else:
        w_eff, b_eff = w2, b2
    logits = jnp.dot(h, w_eff.astype(jnp.bfloat16),
                     preferred_element_type=jnp.float32) + b_eff
    prob = jax.nn.sigmoid(logits)
    y = labels.astype(jnp.float32)
    bce = (jnp.maximum(logits, 0.0) - logits * y
           + jnp.log(1.0 + jnp.exp(-jnp.abs(logits))))
    loss = jnp.mean(bce)
    pred = (prob > 0.5).astype(jnp.int32)
    return prob, loss, pred


if __name__ == "__main__":
    # Small deterministic setup (batch, seq, hdd_size, num_labels).
    B, S, H, L = 2, 8, 32, 8
    key = jax.random.PRNGKey(0)
    k_hid, k_w1, k_b1, k_w2, k_b2, k_lab = jax.random.split(key, 6)

    # TODO(synk): the pretrained AutoModel encoder has no standalone Pallas
    # equivalent; its [B, S, H] output is synthesized here.
    hidden = jax.random.normal(k_hid, (B, S, H), dtype=jnp.float32)

    # one_more_layer: Linear(H, H) — stored pre-transposed as [in, out]
    w1 = jax.random.normal(k_w1, (H, H), dtype=jnp.float32) * (1.0 / jnp.sqrt(H))
    b1 = jax.random.normal(k_b1, (H,), dtype=jnp.float32) * 0.01
    # classifier: Linear(H, L) — stored pre-transposed as [in, out]
    w2 = jax.random.normal(k_w2, (H, L), dtype=jnp.float32) * (1.0 / jnp.sqrt(H))
    b2 = jax.random.normal(k_b2, (L,), dtype=jnp.float32) * 0.01

    labels = (jax.random.uniform(k_lab, (B, L)) > 0.5).astype(jnp.float32)

    prob, loss, pred = multi_label_classifier_forward(hidden, labels,
                                                      w1, b1, w2, b2)
    jax.block_until_ready((prob, loss, pred))

    # Verify against the plain-JAX reference (same fused bf16/f32 math).
    prob_r, loss_r, pred_r = reference_forward(hidden, labels, w1, b1, w2, b2)
    # prob is written back in bf16 -> ~3 decimal digits.
    assert jnp.allclose(prob, prob_r, atol=1e-2), "prob mismatch"
    assert jnp.allclose(loss, loss_r, atol=1e-5), "loss mismatch"
    assert jnp.array_equal(pred, pred_r), "pred mismatch"

    # Cross-check against torch.nn.BCELoss semantics (sigmoid -> clamped log);
    # identical away from logit saturation, which holds at these magnitudes.
    log_p = jnp.maximum(jnp.log(prob_r), -100.0)
    log_1mp = jnp.maximum(jnp.log(1.0 - prob_r), -100.0)
    loss_torch = jnp.mean(-(labels * log_p + (1.0 - labels) * log_1mp))
    assert jnp.allclose(loss, loss_torch, atol=1e-4), "torch-BCE semantics mismatch"

    print("KERNEL_OK")
</pallas_src>

<mosaic_0001>
module attributes {stable_mosaic.version = 11 : i64} {
  func.func @head_kernel(%arg0: i32, %arg1: memref<32x32xbf16, #tpu.memory_space<vmem>>, %arg2: memref<32x128xbf16, #tpu.memory_space<vmem>>, %arg3: memref<32x128xbf16, #tpu.memory_space<vmem>>, %arg4: memref<1x128xf32, #tpu.memory_space<vmem>>, %arg5: memref<32x128xbf16, #tpu.memory_space<vmem>>, %arg6: memref<32x128xi8, #tpu.memory_space<vmem>>, %arg7: memref<8x128xf32, #tpu.memory_space<vmem>>) attributes {dimension_semantics = [#tpu.dimension_semantics<parallel>], iteration_bounds = array<i64: 1>, scalar_prefetch = 0 : i64, scratch_operands = 0 : i64, tpu.core_type = #tpu.core_type<tc>, window_params = [{transform_indices = @transform_0, window_bounds = array<i64: 32, 32>}, {transform_indices = @transform_1, window_bounds = array<i64: 32, 128>}, {pipeline_mode = #tpu.pipeline_mode<synchronous>, transform_indices = @transform_2, window_bounds = array<i64: 32, 128>}, {pipeline_mode = #tpu.pipeline_mode<synchronous>, transform_indices = @transform_3, window_bounds = array<i64: 1, 128>}, {transform_indices = @transform_4, window_bounds = array<i64: 32, 128>}, {transform_indices = @transform_5, window_bounds = array<i64: 32, 128>}, {transform_indices = @transform_6, window_bounds = array<i64: 8, 128>}]} {
    %c0 = arith.constant 0 : index
    %c0_0 = arith.constant 0 : index
    %0 = vector.load %arg1[%c0, %c0_0] : memref<32x32xbf16, #tpu.memory_space<vmem>>, vector<32x32xbf16>
    %c0_1 = arith.constant 0 : index
    %c0_2 = arith.constant 0 : index
    %1 = vector.load %arg3[%c0_1, %c0_2] : memref<32x128xbf16, #tpu.memory_space<vmem>>, vector<32x128xbf16>
    %cst = arith.constant dense<0.000000e+00> : vector<32x128xf32>
    %2 = tpu.matmul %0, %1, %cst {dimension_numbers = #tpu.dot_dimension_numbers<[1], [0], [0], [1], [0, 0, 1, 1], [], []>} : vector<32x32xbf16>, vector<32x128xbf16>, vector<32x128xf32> -> vector<32x128xf32>
    %c0_3 = arith.constant 0 : index
    %c0_4 = arith.constant 0 : index
    %3 = vector.load %arg4[%c0_3, %c0_4] : memref<1x128xf32, #tpu.memory_space<vmem>>, vector<1x128xf32>
    %4 = vector.broadcast %3 : vector<1x128xf32> to vector<32x128xf32>
    %5 = arith.addf %2, %4 : vector<32x128xf32>
    %6 = math.absf %5 : vector<32x128xf32>
    %cst_5 = arith.constant 0.000000e+00 : f32
    %7 = vector.broadcast %cst_5 : f32 to vector<32x128xf32>
    %8 = arith.subf %7, %6 : vector<32x128xf32>
    %9 = math.exp %8 : vector<32x128xf32>
    %cst_6 = arith.constant 1.000000e+00 : f32
    %10 = vector.broadcast %cst_6 : f32 to vector<32x128xf32>
    %11 = arith.addf %10, %9 : vector<32x128xf32>
    %cst_7 = arith.constant 1.000000e+00 : f32
    %12 = vector.broadcast %cst_7 : f32 to vector<32x128xf32>
    %13 = arith.divf %12, %11 : vector<32x128xf32>
    %cst_8 = arith.constant 0.000000e+00 : f32
    %14 = vector.broadcast %cst_8 : f32 to vector<32x128xf32>
    %15 = arith.cmpf oge, %5, %14 : vector<32x128xf32>
    %16 = arith.mulf %9, %13 : vector<32x128xf32>
    %17 = arith.select %15, %13, %16 : vector<32x128xi1>, vector<32x128xf32>
    %18 = arith.truncf %17 : vector<32x128xf32> to vector<32x128xbf16>
    %c0_9 = arith.constant 0 : index
    %c0_10 = arith.constant 0 : index
    %19 = vector.load %arg5[%c0_9, %c0_10] : memref<32x128xbf16, #tpu.memory_space<vmem>>, vector<32x128xbf16>
    tpu.vector_store %arg5[%c0_9, %c0_10], %18 {strides = array<i32>} : memref<32x128xbf16, #tpu.memory_space<vmem>>, vector<32x128xbf16>,
    %cst_11 = arith.constant 0.000000e+00 : f32
    %20 = vector.broadcast %cst_11 : f32 to vector<32x128xf32>
    %21 = arith.cmpf ogt, %5, %20 : vector<32x128xf32>
    %22 = arith.extui %21 : vector<32x128xi1> to vector<32x128xi8>
    %c0_12 = arith.constant 0 : index
    %c0_13 = arith.constant 0 : index
    %23 = vector.load %arg6[%c0_12, %c0_13] : memref<32x128xi8, #tpu.memory_space<vmem>>, vector<32x128xi8>
    tpu.vector_store %arg6[%c0_12, %c0_13], %22 {strides = array<i32>} : memref<32x128xi8, #tpu.memory_space<vmem>>, vector<32x128xi8>,
    %c0_14 = arith.constant 0 : index
    %c0_15 = arith.constant 0 : index
    %24 = vector.load %arg2[%c0_14, %c0_15] : memref<32x128xbf16, #tpu.memory_space<vmem>>, vector<32x128xbf16>
    %25 = arith.extf %24 : vector<32x128xbf16> to vector<32x128xf32>
    %cst_16 = arith.constant 0.000000e+00 : f32
    %26 = vector.broadcast %cst_16 : f32 to vector<32x128xf32>
    %27 = arith.maximumf %5, %26 : vector<32x128xf32>
    %28 = arith.mulf %5, %25 : vector<32x128xf32>
    %29 = arith.subf %27, %28 : vector<32x128xf32>
    %cst_17 = arith.constant 1.000000e+00 : f32
    %30 = vector.broadcast %cst_17 : f32 to vector<32x128xf32>
    %31 = arith.addf %30, %9 : vector<32x128xf32>
    %32 = math.log %31 : vector<32x128xf32>
    %33 = arith.addf %29, %32 : vector<32x128xf32>
    %c32_i32 = arith.constant 32 : i32
    %34 = arith.muli %arg0, %c32_i32 : i32
    %35 = tpu.iota {dimensions = array<i32: 0>} : vector<32x128xi32>
    %36 = vector.broadcast %34 : i32 to vector<32x128xi32>
    %37 = arith.addi %36, %35 : vector<32x128xi32>
    %c2_i32 = arith.constant 2 : i32
    %38 = vector.broadcast %c2_i32 : i32 to vector<32x128xi32>
    %39 = arith.cmpi slt, %37, %38 : vector<32x128xi32>
    %cst_18 = arith.constant 0.000000e+00 : f32
    %40 = vector.broadcast %cst_18 : f32 to vector<32x128xf32>
    %41 = arith.select %39, %33, %40 : vector<32x128xi1>, vector<32x128xf32>
    %42 = tpu.iota {dimensions = array<i32: 1>} : vector<32x128xi32>
    %c8_i32 = arith.constant 8 : i32
    %43 = vector.broadcast %c8_i32 : i32 to vector<32x128xi32>
    %44 = arith.cmpi slt, %42, %43 : vector<32x128xi32>
    %cst_19 = arith.constant 0.000000e+00 : f32
    %45 = vector.broadcast %cst_19 : f32 to vector<32x128xf32>
    %46 = arith.select %44, %41, %45 : vector<32x128xi1>, vector<32x128xf32>
    %47 = vector.shape_cast %46 : vector<32x128xf32> to vector<1x32x128xf32>
    %cst_20 = arith.constant dense<0.000000e+00> : vector<1xf32>
    %48 = vector.multi_reduction <add>, %47, %cst_20 [1, 2] : vector<1x32x128xf32> to vector<1xf32>
    %49 = vector.shape_cast %48 : vector<1xf32> to vector<1x1x1xf32>
    %50 = vector.extract %49[0, 0, 0] : f32 from vector<1x1x1xf32>
    %cst_21 = arith.constant 6.250000e-02 : f32
    %51 = arith.mulf %50, %cst_21 : f32
    %52 = vector.broadcast %51 : f32 to vector<8x128xf32>
    %c0_22 = arith.constant 0 : index
    %c0_23 = arith.constant 0 : index
    %53 = vector.load %arg7[%c0_22, %c0_23] : memref<8x128xf32, #tpu.memory_space<vmem>>, vector<8x128xf32>
    tpu.vector_store %arg7[%c0_22, %c0_23], %52 {strides = array<i32>} : memref<8x128xf32, #tpu.memory_space<vmem>>, vector<8x128xf32>,
    return
  }
  func.func @transform_0(%arg0: i32) -> (i32, i32) {
    %c0_i32 = arith.constant 0 : i32
    %c0_i32_0 = arith.constant 0 : i32
    return %arg0, %c0_i32 : i32, i32
  }
  func.func @transform_1(%arg0: i32) -> (i32, i32) {
    %c0_i32 = arith.constant 0 : i32
    %c0_i32_0 = arith.constant 0 : i32
    return %arg0, %c0_i32 : i32, i32
  }
  func.func @transform_2(%arg0: i32) -> (i32, i32) {
    %c0_i32 = arith.constant 0 : i32
    %c0_i32_0 = arith.constant 0 : i32
    %c0_i32_1 = arith.constant 0 : i32
    return %c0_i32, %c0_i32_0 : i32, i32
  }
  func.func @transform_3(%arg0: i32) -> (i32, i32) {
    %c0_i32 = arith.constant 0 : i32
    %c0_i32_0 = arith.constant 0 : i32
    %c0_i32_1 = arith.constant 0 : i32
    return %c0_i32, %c0_i32_0 : i32, i32
  }
  func.func @transform_4(%arg0: i32) -> (i32, i32) {
    %c0_i32 = arith.constant 0 : i32
    %c0_i32_0 = arith.constant 0 : i32
    return %arg0, %c0_i32 : i32, i32
  }
  func.func @transform_5(%arg0: i32) -> (i32, i32) {
    %c0_i32 = arith.constant 0 : i32
    %c0_i32_0 = arith.constant 0 : i32
    return %arg0, %c0_i32 : i32, i32
  }
  func.func @transform_6(%arg0: i32) -> (i32, i32) {
    %c0_i32 = arith.constant 0 : i32
    %c0_i32_0 = arith.constant 0 : i32
    return %arg0, %c0_i32 : i32, i32
  }
}

</mosaic_0001>

<bundles_post_ra>
// kernel: tpu_custom_call.1
= control target key start
LH: loop header
LB: loop body
LE: loop exit
PB: predicated region body
PF: predicated region fallthrough
CT: control target
= control target key end

     0   :  { %12 = vsyncpa [#allocation3], 0  ;;  %s683_s0 = inlined_call_operand.hbm [shape: bf16[32,32], index: 0, kind: input, shape index: {}]   ;;  %s684_s1 = inlined_call_operand.hbm [shape: bf16[32,128], index: 1, kind: input, shape index: {}]   ;;  %s685_s2 = inlined_call_operand.hbm [shape: bf16[32,128], index: 2, kind: input, shape index: {}]   ;;  %s686_s3 = inlined_call_operand.vmem [shape: f32[1,128], index: 3, kind: input, shape index: {}]   ;;  %s687_s4 = inlined_call_operand.hbm [shape: bf16[32,128], index: 4, kind: output, shape index: {0}]   ;;  %s688_s5 = inlined_call_operand.hbm [shape: s8[32,128], index: 5, kind: output, shape index: {1}]   ;;  %s689_s6 = inlined_call_operand.hbm [shape: f32[8,128], index: 6, kind: output, shape index: {2}]  }
   0x1   :  { %13 = vsyncpa [#allocation6], 0 }
   0x2   :  { %14 = vsyncpa [#allocation4], 0 }
   0x3   :  { %15 = vsyncpa [#allocation10], 0  ;;  %s524_s21 = smov [#allocation5]   ;;  %s525_s23 = smov [#allocation2]  }
   0x4   :  { %s33_s22 = sshll.u32 %s524_s21, 4  ;;  %s21_s24 = sshll.u32 %s525_s23, 4  ;;  %s34_s22 = int_to_ptr.vmem [resolvable:$true] %s33_s22  ;;  %s570_s24 = int_to_ptr.vmem [resolvable:$true] %s21_s24 }
   0x5   :  { %s384_s27 = scalar_lea.hbm %s684_s1, 256 }
   0x6   :  { %p385_p0 = scmp.ne.s32.totalorder %s684_s1, %s384_s27  ;;  %p388_p1 = scmp.lt.u32.totalorder %s384_s27, %s684_s1 }
   0x8   :  { %p390_p2 = pnand %p388_p1, %p385_p0 }
   0xa   :  { %393 = shalt.err (!%p390_p2)
}
   0xb   :  { %s394_s8 = scalar_lea.vmem %s34_s22, 256  ;;  %p399_p4 = scmp.lt.s32.totalorder %s34_s22, %s34_s22 }
   0xc   :  { %p395_p3 = scmp.ne.s32.totalorder %s34_s22, %s394_s8  ;;  %p400_p5 = scmp.lt.s32.totalorder %s394_s8, %s394_s8 }
   0xe   :  { %p401_p6 = por %p400_p5, %p399_p4 }
  0x10   :  { %p402_p7 = pnand %p401_p6, %p395_p3 }
  0x12   :  { %405 = shalt.err (!%p402_p7)
}
  0x13   :  { %s526_s9 = smov 64   ;;  %s527_s10 = smov 4  }
  0x14   :  { %39 = dma.hbm_to_vmem [thread:$0]  %s684_s1, 256, %s34_s22, [#allocation6], %s526_s9, %s526_s9, %s527_s10  }
  0x15   :  { %s406_s15 = scalar_lea.hbm %s683_s0, 256 }
  0x16   :  { %p407_p8 = scmp.ne.s32.totalorder %s683_s0, %s406_s15  ;;  %p410_p9 = scmp.lt.u32.totalorder %s406_s15, %s683_s0 }
  0x18   :  { %p412_p10 = pnand %p410_p9, %p407_p8 }
  0x1a   :  { %415 = shalt.err (!%p412_p10)
}
  0x1b   :  { %s416_s20 = scalar_lea.vmem %s570_s24, 256  ;;  %p421_p12 = scmp.lt.s32.totalorder %s570_s24, %s570_s24 }
  0x1c   :  { %p417_p11 = scmp.ne.s32.totalorder %s570_s24, %s416_s20  ;;  %p422_p13 = scmp.lt.s32.totalorder %s416_s20, %s416_s20 }
  0x1e   :  { %p423_p0 = por %p422_p13, %p421_p12 }
  0x20   :  { %p424_p1 = pnand %p423_p0, %p417_p11 }
  0x22   :  { %427 = shalt.err (!%p424_p1)
}
  0x23   :  { %27 = dma.hbm_to_vmem [thread:$0]  %s683_s0, 256, %s570_s24, [#allocation3], %s526_s9, %s526_s9, %s527_s10  }
  0x24   :  { %s528_s22 = smov [#allocation7]   ;;  %s428_s27 = scalar_lea.hbm %s685_s2, 256 }
  0x25   :  { %s45_s23 = sshll.u32 %s528_s22, 4  ;;  %p429_p2 = scmp.ne.s32.totalorder %s685_s2, %s428_s27  ;;  %s46_s23 = int_to_ptr.vmem [resolvable:$true] %s45_s23 }
  0x26   :  { %p432_p3 = scmp.lt.u32.totalorder %s428_s27, %s685_s2 }
  0x28   :  { %p434_p4 = pnand %p432_p3, %p429_p2 }
  0x2a   :  { %437 = shalt.err (!%p434_p4)
}
  0x2b   :  { %s438_s8 = scalar_lea.vmem %s46_s23, 256  ;;  %p443_p6 = scmp.lt.s32.totalorder %s46_s23, %s46_s23 }
  0x2c   :  { %p439_p5 = scmp.ne.s32.totalorder %s46_s23, %s438_s8  ;;  %p444_p7 = scmp.lt.s32.totalorder %s438_s8, %s438_s8 }
  0x2e   :  { %p445_p8 = por %p444_p7, %p443_p6 }
  0x30   :  { %p446_p9 = pnand %p445_p8, %p439_p5 }
  0x32   :  { %449 = shalt.err (!%p446_p9)
}
  0x33   :  { %51 = dma.hbm_to_vmem [thread:$0]  %s685_s2, 256, %s46_s23, [#allocation6], %s526_s9, %s526_s9, %s527_s10  }
  0x34   :  { %516 = dma.done.wait [#allocation3], 256  }
  0x35   :  { %517 = vsyncadd [#allocation3], 4294967040 }
  0x36   :  { %518 = dma.done.wait [#allocation6], 512  }
  0x37   :  { %519 = vsyncadd [#allocation6], 4294966784  ;;  %v362_v0 = vld [vmem:[#allocation7] sm:$0xff]   ;;  %v363_v1 = vld [vmem:[#allocation7 + $0x8] sm:$0xff]   ;;  %vm103_vm0 = vcmask 261120   ;;  %v529_v25 = vmov 0   ;;  %v245_v37 = vlaneseq }
  0x38   :  { %341 = vmatprep.subr.bf16.mxu0 %v362_v0  ;;  %v364_v2 = vld [vmem:[#allocation2] sm:$0xff]   ;;  %v365_v3 = vld [vmem:[#allocation2 + $0x8] sm:$0xff]   ;;  %v212_v35 = vld [vmem:[#allocation5] sm:$0xf]  ;;  %s530_s2 = smov [#allocation9]   ;;  %s531_s9 = smov [#allocation8]  }
  0x39   :  { %342 = vmatpush3.bf16.msra.mxu0 %v362_v0  ;;  %345 = vmatprep.mubr.msk.bf16.mxu0 %vm103_vm0, %v364_v2  ;;  %v330_v4 = vld [vmem:[%s686_s3] ss:$0 sm:$0xff]  ;;  %v216_v36 = vunpack.c.l.bf16 %v212_v35  ;;  %v246_v45 = vshrl.u32 %v245_v37, 7  ;;  %v264_v48 = vand.u32 127, %v245_v37  ;;  %s303_s3 = sshll.u32 %s530_s2, 4  ;;  %s290_s10 = sshll.u32 %s531_s9, 4  ;;  %s304_s3 = int_to_ptr.vmem [resolvable:$true] %s303_s3  ;;  %s291_s10 = int_to_ptr.vmem [resolvable:$true] %s290_s10 }
  0x3a   :  { %343 = vmatprep.subr.bf16.mxu0 %v363_v1  ;;  %s450_s13 = scalar_lea.vmem %s304_s3, 128  ;;  %p455_p11 = scmp.lt.s32.totalorder %s304_s3, %s304_s3 }
  0x3b   :  { %vm255_vm12 = vcmp.lt.s32.totalorder %v246_v45, 2  ;;  %vm265_vm13 = vcmp.lt.s32.totalorder %v264_v48, 8  ;;  %p451_p10 = scmp.ne.s32.totalorder %s304_s3, %s450_s13  ;;  %p456_p12 = scmp.lt.s32.totalorder %s450_s13, %s450_s13 }
  0x3d   :  { %344 = vmatpush3.bf16.msra.mxu0 %v363_v1  ;;  %p457_p13 = por %p456_p12, %p455_p11 }
  0x3f   :  { %p458_p0 = pnand %p457_p13, %p451_p10 }
  0x40   :  { %346 = vmatmul.mubr.msk.bf16.vlgmr.msra.gmra.mrb[0].mxu0 %vm103_vm0, %v365_v3 }
 0x113   :  { %v347_v5 = vpop.f32.mrb[0].mxu0 }
 0x114   :  { %v625_v6 = vadd.f32 %v347_v5, %v330_v4  ;;  %v144_v7 = vpop.f32.mrb[1].mxu0 }
 0x115   :  { %v627_v8 = vadd.f32 %v330_v4, %v144_v7  ;;  %v348_v9 = vpop.f32.mrb[2].mxu0 }
 0x116   :  { %v161_v10 = vand.u32 2147483647, %v625_v6  ;;  %v630_v11 = vadd.f32 %v348_v9, %v330_v4  ;;  %v147_v12 = vpop.f32.mrb[3].mxu0  ;;  %vm205_vm1 = vcmp.gt.f32.partialorder %v625_v6, 0.0  ;;  %vm189_vm8 = vcmp.ge.f32.partialorder %v625_v6, 0.0 }
 0x117   :  { %v159_v13 = vand.u32 2147483647, %v627_v8  ;;  %v633_v14 = vadd.f32 %v330_v4, %v147_v12  ;;  %vm203_vm5 = vcmp.gt.f32.partialorder %v627_v8, 0.0  ;;  %v220_v41 = vmax.f32 %v627_v8, 0.0 }
 0x118   :  { %v165_v15 = vsub.f32 0.0, %v161_v10  ;;  %v162_v16 = vand.u32 2147483647, %v630_v11  ;;  %vm206_vm2 = vcmp.gt.f32.partialorder %v630_v11, 0.0  ;;  %v224_v42 = vmul.f32 %v216_v36, %v627_v8 }
 0x119   :  { %v163_v17 = vsub.f32 0.0, %v159_v13  ;;  %v160_v18 = vand.u32 2147483647, %v633_v14  ;;  %vm204_vm3 = vcmp.gt.f32.partialorder %v633_v14, 0.0  ;;  %vm208_vm4 = vmpackc.low %vm206_vm2, %vm205_vm1  ;;  %vm190_vm9 = vcmp.ge.f32.partialorder %v630_v11, 0.0 }
 0x11a   :  { %v171_v19 = vmul.f32 1.442695, %v165_v15  ;;  %v166_v20 = vsub.f32 0.0, %v162_v16  ;;  %vm207_vm6 = vmpackc.low %vm204_vm3, %vm203_vm5  ;;  %vm187_vm10 = vcmp.ge.f32.partialorder %v627_v8, 0.0  ;;  %vm188_vm11 = vcmp.ge.f32.partialorder %v633_v14, 0.0 }
 0x11b   :  { %v167_v21 = vmul.f32 1.442695, %v163_v17  ;;  %v164_v22 = vsub.f32 0.0, %v160_v18  ;;  %vm209_vm7 = vmpackc.even %vm208_vm4, %vm207_vm6  ;;  %v228_v53 = vsub.f32 %v220_v41, %v224_v42 }
 0x11c   :  { %366 = vpow2.f32 %v171_v19  ;;  %v173_v23 = vmul.f32 1.442695, %v166_v20  ;;  %v210_v26 = vsel %vm209_vm7, 16843009, %v529_v25 }
 0x11d   :  { %368 = vpow2.f32 %v167_v21  ;;  %v169_v24 = vmul.f32 1.442695, %v164_v22  ;;  %211 = vst [vmem:[#allocation9] sm:$0xff] %v210_v26 }
 0x11e   :  { %370 = vpow2.f32 %v173_v23 }
 0x11f   :  { %372 = vpow2.f32 %v169_v24 }
 0x126   :  { %v367_v27 = vpop.eup %366 }
 0x127   :  { %v369_v28 = vpop.eup %368  ;;  %v177_v29 = vadd.f32 1.0, %v367_v27 }
 0x128   :  { %v371_v30 = vpop.eup %370  ;;  %v175_v31 = vadd.f32 1.0, %v369_v28 }
 0x129   :  { %v373_v32 = vpop.eup %372  ;;  %374 = vrcp.f32 %v177_v29  ;;  %v178_v33 = vadd.f32 1.0, %v371_v30 }
 0x12a   :  { %v176_v34 = vadd.f32 1.0, %v373_v32  ;;  %376 = vrcp.f32 %v175_v31 }
 0x12b   :  { %378 = vrcp.f32 %v178_v33 }
 0x12c   :  { %380 = vrcp.f32 %v176_v34 }
 0x12d   :  { %382 = vlog2.f32 %v175_v31 }
 0x133   :  { %v375_v38 = vpop.eup %374 }
 0x134   :  { %v377_v39 = vpop.eup %376  ;;  %v193_v40 = vmul.f32 %v375_v38, %v367_v27 }
 0x135   :  { %v379_v43 = vpop.eup %378  ;;  %v191_v44 = vmul.f32 %v377_v39, %v369_v28 }
 0x136   :  { %v381_v46 = vpop.eup %380  ;;  %v194_v47 = vmul.f32 %v379_v43, %v371_v30  ;;  %v197_v51 = vsel %vm189_vm8, %v375_v38, %v193_v40 }
 0x137   :  { %v383_v49 = vpop.eup %382  ;;  %v192_v50 = vmul.f32 %v381_v46, %v373_v32  ;;  %v195_v56 = vsel %vm187_vm10, %v377_v39, %v191_v44 }
 0x138   :  { %v198_v52 = vsel %vm190_vm9, %v379_v43, %v194_v47  ;;  %v233_v54 = vmul.f32 0.6931472, %v383_v49 }
 0x139   :  { %v200_v55 = vpack.c.bf16 %v198_v52, %v197_v51  ;;  %v196_v57 = vsel %vm188_vm11, %v381_v46, %v192_v50 }
 0x13a   :  { %v199_v58 = vpack.c.bf16 %v196_v57, %v195_v56  ;;  %v240_v59 = vadd.f32 %v233_v54, %v228_v53 }
 0x13b   :  { %202 = vst [vmem:[#allocation8 + $0x8] sm:$0xff] %v200_v55 }
 0x13c   :  { %201 = vst [vmem:[#allocation8] sm:$0xff] %v199_v58  ;;  %v259_v60 = vsel %vm255_vm12, %v240_v59, 0.0 }
 0x13d   :  { %v266_v61 = vsel %vm265_vm13, %v259_v60, 0.0 }
 0x13e   :  { %273 = vadd.xlane.f32.xlu0 %v266_v61 }
 0x13f   :  { %461 = shalt.err (!%p458_p0)
}
 0x140   :  { %s462_s16 = scalar_lea.hbm %s688_s5, 128 }
 0x141   :  { %p463_p1 = scmp.ne.s32.totalorder %s688_s5, %s462_s16  ;;  %p466_p2 = scmp.lt.u32.totalorder %s462_s16, %s688_s5 }
 0x143   :  { %p468_p3 = pnand %p466_p2, %p463_p1 }
 0x145   :  { %471 = shalt.err (!%p468_p3)
}
 0x146   :  { %306 = dma.vmem_to_hbm [thread:$0]  %s304_s3, 128, %s688_s5, [#allocation10]  }
 0x147   :  { %s472_s22 = scalar_lea.vmem %s291_s10, 256  ;;  %p477_p5 = scmp.lt.s32.totalorder %s291_s10, %s291_s10 }
 0x148   :  { %p473_p4 = scmp.ne.s32.totalorder %s291_s10, %s472_s22  ;;  %p478_p6 = scmp.lt.s32.totalorder %s472_s22, %s472_s22 }
 0x14a   :  { %p479_p7 = por %p478_p6, %p477_p5 }
 0x14c   :  { %p480_p8 = pnand %p479_p7, %p473_p4 }
 0x14e   :  { %483 = shalt.err (!%p480_p8)
}
 0x14f   :  { %s484_s26 = scalar_lea.hbm %s687_s4, 256 }
 0x150   :  { %p485_p9 = scmp.ne.s32.totalorder %s687_s4, %s484_s26  ;;  %p488_p10 = scmp.lt.u32.totalorder %s484_s26, %s687_s4 }
 0x152   :  { %p490_p11 = pnand %p488_p10, %p485_p9 }
 0x154   :  { %493 = shalt.err (!%p490_p11)
}
 0x155   :  { %s532_s5 = smov 128   ;;  %s533_s7 = smov 8  }
 0x156   :  { %296 = dma.vmem_to_hbm [thread:$0]  %s291_s10, 256, %s687_s4, [#allocation4], %s532_s5, %s532_s5, %s533_s7  }
 0x157   :  { %s534_s24 = smov [#allocation11]  }
 0x158   :  { %s313_s11 = sshll.u32 %s534_s24, 4  ;;  %s314_s11 = int_to_ptr.vmem [resolvable:$true] %s313_s11 }
 0x159   :  { %s494_s3 = scalar_lea.vmem %s314_s11, 128  ;;  %p499_p13 = scmp.lt.s32.totalorder %s314_s11, %s314_s11 }
 0x15a   :  { %p495_p12 = scmp.ne.s32.totalorder %s314_s11, %s494_s3  ;;  %p500_p0 = scmp.lt.s32.totalorder %s494_s3, %s494_s3 }
 0x15c   :  { %p501_p1 = por %p500_p0, %p499_p13 }
 0x15e   :  { %p502_p2 = pnand %p501_p1, %p495_p12 }
 0x1cb   :  { %v274_v62 = vpop.xlane.xlu0 %273 }
 0x1cc   :  { %v275_v63 = vrot.slane %v274_v62, 4 }
 0x1ce   :  { %v276_v0 = vadd.f32 %v275_v63, %v274_v62 }
 0x1d0   :  { %v277_v1 = vrot.slane %v276_v0, 2 }
 0x1d2   :  { %v278_v2 = vadd.f32 %v277_v1, %v276_v0 }
 0x1d4   :  { %v279_v3 = vrot.slane %v278_v2, 1 }
 0x1d6   :  { %v280_v4 = vadd.f32 %v279_v3, %v278_v2 }
 0x1d8   :  { %349 = vpush %v280_v4 }
 0x209   :  { %s350_s12 = spop %349 }
 0x20a   :  { %s282_s2 = smul.f32 0.0625, %s350_s12 }
 0x20c   :  { %v283_v5 = vstv %s282_s2 }
 0x20d   :  { %284 = vst [vmem:[#allocation11] sm:$0xff] %v283_v5 }
 0x20e   :  { %505 = shalt.err (!%p502_p2)
}
 0x20f   :  { %s506_s10 = scalar_lea.hbm %s689_s6, 128 }
 0x210   :  { %p507_p3 = scmp.ne.s32.totalorder %s689_s6, %s506_s10  ;;  %p510_p4 = scmp.lt.u32.totalorder %s506_s10, %s689_s6 }
 0x212   :  { %p512_p5 = pnand %p510_p4, %p507_p3 }
 0x214   :  { %515 = shalt.err (!%p512_p5)
}
 0x215   :  { %316 = dma.vmem_to_hbm [thread:$0]  %s314_s11, 128, %s689_s6, [#allocation10]  }
 0x216   :  { %520 = dma.done.wait [#allocation4], 256  }
 0x217   :  { %521 = vsyncadd [#allocation4], 4294967040 }
 0x218   :  { %522 = dma.done.wait [#allocation10], 256  }
 0x219   :  { %523 = vsyncadd [#allocation10], 4294967040 }
 0x21a   :  { %326 = vsyncpa [#allocation3], 1 }
 0x21b   :  { %327 = vsyncpa [#allocation6], 1 }
 0x21c   :  { %328 = vsyncpa [#allocation4], 1 }
 0x21d   :  { %329 = vsyncpa [#allocation10], 1 }

</bundles_post_ra>
